<compile_context>
chip_gen: v5e
topology: v5e:2x2
jax: 0.10.0
libtpu: 0.0.40
codegen_flags: <defaults>
</compile_context>

<pallas_src>
import functools

import jax
import jax.numpy as jnp
from jax.experimental import pallas as pl
from jax.experimental.pallas import tpu as pltpu

_NEG = jnp.float32(-1e30)   # effective -inf for padded logit columns


def _round_up(x, m):
    return ((x + m - 1) // m) * m


def window_classifier_kernel(ids_ref, m_ref, b01_ref, w2_ref, b2_ref, o_ref,
                             *, wsize, vocab):
    # ids_ref: [TB, wsize]      int32 window token ids
    # m_ref:   [WV_pad, H_pad]  bf16 fused (embedding ∘ window2hidden ∘ hidden2hidden)
    #                           weight; row j*vocab+v = embed[v] @ (w0@w1)[j*E:(j+1)*E]
    # b01_ref: [1, H_pad]       f32 fused bias (zero in padded hidden columns)
    # w2_ref:  [H_pad, T_pad]   bf16 hidden2tag weight (zero in padded rows/cols)
    # b2_ref:  [1, T_pad]       f32 hidden2tag bias (-1e30 in padded tag columns)
    # o_ref:   [TB, T]          f32 log-probabilities (only the T real tag columns)
    ids = ids_ref[...]                                    # [TB, wsize] int32
    tb = ids.shape[0]
    wv = m_ref.shape[0]

    # One-hot selector [TB, WV_pad]: column (j*vocab + ids[b, j]) is 1 for each of
    # the wsize window positions.  This turns the embedding gather into an MXU
    # matmul — no data-dependent addressing, no HBM round trip for the embeddings.
    col = jax.lax.broadcasted_iota(jnp.int32, (tb, wv), 1)
    hit = None
    for j in range(wsize):
        hj = col == (ids[:, j:j + 1] + j * vocab)         # [TB, WV_pad] bool
        hit = hj if hit is None else jnp.logical_or(hit, hj)
    sel = jnp.where(hit, 1.0, 0.0).astype(jnp.bfloat16)   # exact 0/1 in bf16

    # embedding + window2hidden + hidden2hidden (all fused into one matmul), ReLU.
    h = jnp.dot(sel, m_ref[...], preferred_element_type=jnp.float32) + b01_ref[...]
    h = jnp.maximum(h, 0.0)

    # hidden2tag
    logits = jnp.dot(h.astype(jnp.bfloat16), w2_ref[...],
                     preferred_element_type=jnp.float32) + b2_ref[...]

    # LogSoftmax over the (padded) tag dimension — entirely in f32.  Padded columns
    # carry a -1e30 bias, so exp() underflows to 0 and they don't perturb max/sum.
    mx = jnp.max(logits, axis=-1, keepdims=True)
    shifted = logits - mx
    lse = jnp.log(jnp.sum(jnp.exp(shifted), axis=-1, keepdims=True))
    out = shifted - lse

    # Store only the real tag columns (16x less HBM writeback than a 128-lane pad).
    # TODO(synk): a further ~2x on the store path is possible by packing 16 batch
    # rows x 8 tags into one 128-lane row (dense vst) and unpacking in the wrapper.
    o_ref[...] = out[:, : o_ref.shape[1]]


@jax.jit
def window_classifier_forward(inputs, params):
    """inputs: int32 [B, wsize]; returns log-probs [B, tag_size] (f32)."""
    embed_w = params["embed"]            # [V, E]
    w0, b0 = params["w0"], params["b0"]  # [wsize*E, H], [H]
    w1, b1 = params["w1"], params["b1"]  # [H, H], [H]
    w2, b2 = params["w2"], params["b2"]  # [H, T], [T]

    B, wsize = inputs.shape
    V, E = embed_w.shape
    H = w0.shape[1]
    T = w2.shape[1]

    hi = jax.lax.Precision.HIGHEST

    # --- algebraic fusion of the two back-to-back linears (no nonlinearity between
    #     them):  (x @ w0 + b0) @ w1 + b1 == x @ (w0 @ w1) + (b0 @ w1 + b1)
    w01 = jnp.dot(w0, w1, precision=hi, preferred_element_type=jnp.float32)      # [wsize*E, H]
    b01 = jnp.dot(b0[None, :], w1, precision=hi,
                  preferred_element_type=jnp.float32)[0] + b1                    # [H]

    # --- fold the embedding table in as well:
    #     M[j*V + v, :] = embed[v, :] @ w01[j*E:(j+1)*E, :]
    # so  h_pre = sum_j M[j*V + ids[:, j]] + b01 == onehot(ids) @ M + b01.
    w01_r = w01.reshape(wsize, E, H)
    m_big = jnp.einsum("ve,jeh->jvh", embed_w, w01_r, precision=hi,
                       preferred_element_type=jnp.float32).reshape(wsize * V, H)

    # --- pad the (tiny, VMEM-resident) weights to MXU-friendly shapes (128 only).
    WV_pad = _round_up(wsize * V, 128)
    H_pad = _round_up(H, 128)
    T_pad = _round_up(T, 128)

    m_p = jnp.zeros((WV_pad, H_pad), jnp.float32).at[: wsize * V, :H].set(m_big)
    m_p = m_p.astype(jnp.bfloat16)                               # bf16 MXU operand
    b01_p = jnp.zeros((1, H_pad), jnp.float32).at[0, :H].set(b01)
    w2_p = (jnp.zeros((H_pad, T_pad), jnp.float32).at[:H, :T].set(w2)
            .astype(jnp.bfloat16))
    # Padded tag columns get a huge negative bias -> exp() == 0 in the softmax.
    b2_p = jnp.full((1, T_pad), _NEG, jnp.float32).at[0, :T].set(b2)

    # --- batch tiling: TB rows per grid step (multiple of 8 sublanes).
    TB_MAX = 2048
    if B > TB_MAX:
        TB = TB_MAX
    else:
        # keep >= 2 grid steps where possible so both of v7x's TensorCores run.
        TB = max(8, _round_up((B + 1) // 2, 8))
    B_pad = _round_up(B, TB)

    ids = inputs.astype(jnp.int32)
    if B_pad != B:
        ids = jnp.pad(ids, ((0, B_pad - B), (0, 0)))   # 20 B/row of int32 — negligible

    grid = (B_pad // TB,)
    weight_bytes = (WV_pad * H_pad + H_pad * T_pad) * 2 + (H_pad + T_pad) * 4
    cost = pl.CostEstimate(
        flops=2 * B_pad * (WV_pad * H_pad + H_pad * T_pad),
        transcendentals=B_pad * (T_pad + 1),
        bytes_accessed=B_pad * wsize * 4 + weight_bytes + B_pad * T * 4,
    )

    out = pl.pallas_call(
        functools.partial(window_classifier_kernel, wsize=wsize, vocab=V),
        out_shape=jax.ShapeDtypeStruct((B_pad, T), jnp.float32),
        grid=grid,
        in_specs=[
            pl.BlockSpec((TB, wsize), lambda i: (i, 0)),        # ids: blocked on batch
            pl.BlockSpec((WV_pad, H_pad), lambda i: (0, 0)),    # weights VMEM-resident
            pl.BlockSpec((1, H_pad), lambda i: (0, 0)),
            pl.BlockSpec((H_pad, T_pad), lambda i: (0, 0)),
            pl.BlockSpec((1, T_pad), lambda i: (0, 0)),
        ],
        out_specs=pl.BlockSpec((TB, T), lambda i: (i, 0)),
        compiler_params=pltpu.CompilerParams(
            dimension_semantics=("parallel",)),
        cost_estimate=cost,
    )(ids, m_p, b01_p, w2_p, b2_p)

    # Drop batch padding (tag columns were never padded on the way out).
    return out[:B]


def reference_forward(inputs, params):
    """Pure-JAX reference matching the PyTorch module (no dropout at inference)."""
    embeds = jnp.take(params["embed"], inputs, axis=0)
    window = embeds.reshape(inputs.shape[0], -1)
    h0 = window @ params["w0"] + params["b0"]
    h1 = h0 @ params["w1"] + params["b1"]
    h1 = jnp.maximum(h1, 0.0)
    logits = h1 @ params["w2"] + params["b2"]
    return jax.nn.log_softmax(logits, axis=-1)


def init_params(key, vocab_size, tag_size, embed_size, hidden_size, window_size):
    wsize = 2 * window_size + 1
    in0 = embed_size * wsize
    ks = jax.random.split(key, 7)

    def lin(kw, kb, fan_in, fan_out):
        bound = 1.0 / jnp.sqrt(jnp.float32(fan_in))
        w = jax.random.uniform(kw, (fan_in, fan_out), jnp.float32, -bound, bound)
        b = jax.random.uniform(kb, (fan_out,), jnp.float32, -bound, bound)
        return w, b

    embed = jax.random.normal(ks[0], (vocab_size, embed_size), jnp.float32)
    w0, b0 = lin(ks[1], ks[2], in0, hidden_size)
    w1, b1 = lin(ks[3], ks[4], hidden_size, hidden_size)
    w2, b2 = lin(ks[5], ks[6], hidden_size, tag_size)
    return {"embed": embed, "w0": w0, "b0": b0,
            "w1": w1, "b1": b1, "w2": w2, "b2": b2}


if __name__ == "__main__":
    vocab_size = 50
    tag_size = 8
    embed_size = 16
    hidden_size = 32
    window_size = 2          # window width = 2*2+1 = 5
    batch = 8

    key = jax.random.PRNGKey(0)
    k_params, k_inputs = jax.random.split(key)
    params = init_params(k_params, vocab_size, tag_size, embed_size,
                         hidden_size, window_size)
    inputs = jax.random.randint(
        k_inputs, (batch, 2 * window_size + 1), 0, vocab_size, dtype=jnp.int32)

    logprobs = window_classifier_forward(inputs, params)
    jax.block_until_ready(logprobs)

    # correctness vs. pure-JAX f32 reference of the original (unfused) module;
    # tolerance accounts for bf16 MXU operands inside the kernel.
    ref = reference_forward(inputs, params)
    row_sums = jnp.exp(logprobs).sum(axis=-1)
    assert logprobs.shape == (batch, tag_size)
    assert bool(jnp.allclose(row_sums, 1.0, atol=1e-5))
    assert bool(jnp.allclose(logprobs, ref, atol=2e-2, rtol=2e-2))

    print("KERNEL_OK")
</pallas_src>

<mosaic_0001>
module attributes {stable_mosaic.version = 11 : i64} {
  func.func @window_classifier_kernel(%arg0: i32, %arg1: memref<8x5xi32, #tpu.memory_space<vmem>>, %arg2: memref<256x128xbf16, #tpu.memory_space<vmem>>, %arg3: memref<1x128xf32, #tpu.memory_space<vmem>>, %arg4: memref<128x128xbf16, #tpu.memory_space<vmem>>, %arg5: memref<1x128xf32, #tpu.memory_space<vmem>>, %arg6: memref<8x8xf32, #tpu.memory_space<vmem>>) attributes {dimension_semantics = [#tpu.dimension_semantics<parallel>], iteration_bounds = array<i64: 1>, scalar_prefetch = 0 : i64, scratch_operands = 0 : i64, tpu.core_type = #tpu.core_type<tc>, window_params = [{transform_indices = @transform_0, window_bounds = array<i64: 8, 5>}, {pipeline_mode = #tpu.pipeline_mode<synchronous>, transform_indices = @transform_1, window_bounds = array<i64: 256, 128>}, {pipeline_mode = #tpu.pipeline_mode<synchronous>, transform_indices = @transform_2, window_bounds = array<i64: 1, 128>}, {pipeline_mode = #tpu.pipeline_mode<synchronous>, transform_indices = @transform_3, window_bounds = array<i64: 128, 128>}, {pipeline_mode = #tpu.pipeline_mode<synchronous>, transform_indices = @transform_4, window_bounds = array<i64: 1, 128>}, {transform_indices = @transform_5, window_bounds = array<i64: 8, 8>}]} {
    %c0 = arith.constant 0 : index
    %c0_0 = arith.constant 0 : index
    %0 = vector.load %arg1[%c0, %c0_0] : memref<8x5xi32, #tpu.memory_space<vmem>>, vector<8x5xi32>
    %1 = tpu.iota {dimensions = array<i32: 1>} : vector<8x256xi32>
    %2 = vector.extract_strided_slice %0 {offsets = [0, 0], sizes = [8, 1], strides = [1, 1]} : vector<8x5xi32> to vector<8x1xi32>
    %c0_i32 = arith.constant 0 : i32
    %3 = vector.broadcast %c0_i32 : i32 to vector<8x1xi32>
    %4 = arith.addi %2, %3 : vector<8x1xi32>
    %5 = vector.broadcast %4 : vector<8x1xi32> to vector<8x256xi32>
    %6 = arith.cmpi eq, %1, %5 : vector<8x256xi32>
    %7 = vector.extract_strided_slice %0 {offsets = [0, 1], sizes = [8, 1], strides = [1, 1]} : vector<8x5xi32> to vector<8x1xi32>
    %c50_i32 = arith.constant 50 : i32
    %8 = vector.broadcast %c50_i32 : i32 to vector<8x1xi32>
    %9 = arith.addi %7, %8 : vector<8x1xi32>
    %10 = vector.broadcast %9 : vector<8x1xi32> to vector<8x256xi32>
    %11 = arith.cmpi eq, %1, %10 : vector<8x256xi32>
    %12 = arith.ori %6, %11 : vector<8x256xi1>
    %13 = vector.extract_strided_slice %0 {offsets = [0, 2], sizes = [8, 1], strides = [1, 1]} : vector<8x5xi32> to vector<8x1xi32>
    %c100_i32 = arith.constant 100 : i32
    %14 = vector.broadcast %c100_i32 : i32 to vector<8x1xi32>
    %15 = arith.addi %13, %14 : vector<8x1xi32>
    %16 = vector.broadcast %15 : vector<8x1xi32> to vector<8x256xi32>
    %17 = arith.cmpi eq, %1, %16 : vector<8x256xi32>
    %18 = arith.ori %12, %17 : vector<8x256xi1>
    %19 = vector.extract_strided_slice %0 {offsets = [0, 3], sizes = [8, 1], strides = [1, 1]} : vector<8x5xi32> to vector<8x1xi32>
    %c150_i32 = arith.constant 150 : i32
    %20 = vector.broadcast %c150_i32 : i32 to vector<8x1xi32>
    %21 = arith.addi %19, %20 : vector<8x1xi32>
    %22 = vector.broadcast %21 : vector<8x1xi32> to vector<8x256xi32>
    %23 = arith.cmpi eq, %1, %22 : vector<8x256xi32>
    %24 = arith.ori %18, %23 : vector<8x256xi1>
    %25 = vector.extract_strided_slice %0 {offsets = [0, 4], sizes = [8, 1], strides = [1, 1]} : vector<8x5xi32> to vector<8x1xi32>
    %c200_i32 = arith.constant 200 : i32
    %26 = vector.broadcast %c200_i32 : i32 to vector<8x1xi32>
    %27 = arith.addi %25, %26 : vector<8x1xi32>
    %28 = vector.broadcast %27 : vector<8x1xi32> to vector<8x256xi32>
    %29 = arith.cmpi eq, %1, %28 : vector<8x256xi32>
    %30 = arith.ori %24, %29 : vector<8x256xi1>
    %cst = arith.constant 1.000000e+00 : f32
    %cst_1 = arith.constant 0.000000e+00 : f32
    %31 = vector.broadcast %cst : f32 to vector<8x256xf32>
    %32 = vector.broadcast %cst_1 : f32 to vector<8x256xf32>
    %33 = arith.select %30, %31, %32 : vector<8x256xi1>, vector<8x256xf32>
    %34 = arith.truncf %33 : vector<8x256xf32> to vector<8x256xbf16>
    %c0_2 = arith.constant 0 : index
    %c0_3 = arith.constant 0 : index
    %35 = vector.load %arg2[%c0_2, %c0_3] : memref<256x128xbf16, #tpu.memory_space<vmem>>, vector<256x128xbf16>
    %cst_4 = arith.constant dense<0.000000e+00> : vector<8x128xf32>
    %36 = tpu.matmul %34, %35, %cst_4 {dimension_numbers = #tpu.dot_dimension_numbers<[1], [0], [0], [1], [0, 0, 1, 1], [], []>} : vector<8x256xbf16>, vector<256x128xbf16>, vector<8x128xf32> -> vector<8x128xf32>
    %c0_5 = arith.constant 0 : index
    %c0_6 = arith.constant 0 : index
    %37 = vector.load %arg3[%c0_5, %c0_6] : memref<1x128xf32, #tpu.memory_space<vmem>>, vector<1x128xf32>
    %38 = vector.broadcast %37 : vector<1x128xf32> to vector<8x128xf32>
    %39 = arith.addf %36, %38 : vector<8x128xf32>
    %cst_7 = arith.constant 0.000000e+00 : f32
    %40 = vector.broadcast %cst_7 : f32 to vector<8x128xf32>
    %41 = arith.maximumf %39, %40 : vector<8x128xf32>
    %42 = arith.truncf %41 : vector<8x128xf32> to vector<8x128xbf16>
    %c0_8 = arith.constant 0 : index
    %c0_9 = arith.constant 0 : index
    %43 = vector.load %arg4[%c0_8, %c0_9] : memref<128x128xbf16, #tpu.memory_space<vmem>>, vector<128x128xbf16>
    %cst_10 = arith.constant dense<0.000000e+00> : vector<8x128xf32>
    %44 = tpu.matmul %42, %43, %cst_10 {dimension_numbers = #tpu.dot_dimension_numbers<[1], [0], [0], [1], [0, 0, 1, 1], [], []>} : vector<8x128xbf16>, vector<128x128xbf16>, vector<8x128xf32> -> vector<8x128xf32>
    %c0_11 = arith.constant 0 : index
    %c0_12 = arith.constant 0 : index
    %45 = vector.load %arg5[%c0_11, %c0_12] : memref<1x128xf32, #tpu.memory_space<vmem>>, vector<1x128xf32>
    %46 = vector.broadcast %45 : vector<1x128xf32> to vector<8x128xf32>
    %47 = arith.addf %44, %46 : vector<8x128xf32>
    %cst_13 = arith.constant dense<0xFF800000> : vector<8xf32>
    %48 = vector.multi_reduction <maximumf>, %47, %cst_13 [1] : vector<8x128xf32> to vector<8xf32>
    %49 = vector.shape_cast %48 : vector<8xf32> to vector<8x1xf32>
    %50 = vector.broadcast %49 : vector<8x1xf32> to vector<8x128xf32>
    %51 = arith.subf %47, %50 : vector<8x128xf32>
    %52 = math.exp %51 : vector<8x128xf32>
    %cst_14 = arith.constant dense<0.000000e+00> : vector<8xf32>
    %53 = vector.multi_reduction <add>, %52, %cst_14 [1] : vector<8x128xf32> to vector<8xf32>
    %54 = vector.shape_cast %53 : vector<8xf32> to vector<8x1xf32>
    %55 = math.log %54 : vector<8x1xf32>
    %56 = vector.broadcast %55 : vector<8x1xf32> to vector<8x128xf32>
    %57 = arith.subf %51, %56 : vector<8x128xf32>
    %58 = vector.extract_strided_slice %57 {offsets = [0, 0], sizes = [8, 8], strides = [1, 1]} : vector<8x128xf32> to vector<8x8xf32>
    %c0_15 = arith.constant 0 : index
    %c0_16 = arith.constant 0 : index
    %59 = vector.load %arg6[%c0_15, %c0_16] : memref<8x8xf32, #tpu.memory_space<vmem>>, vector<8x8xf32>
    tpu.vector_store %arg6[%c0_15, %c0_16], %58 {strides = array<i32>} : memref<8x8xf32, #tpu.memory_space<vmem>>, vector<8x8xf32>,
    return
  }
  func.func @transform_0(%arg0: i32) -> (i32, i32) {
    %c0_i32 = arith.constant 0 : i32
    %c0_i32_0 = arith.constant 0 : i32
    return %arg0, %c0_i32 : i32, i32
  }
  func.func @transform_1(%arg0: i32) -> (i32, i32) {
    %c0_i32 = arith.constant 0 : i32
    %c0_i32_0 = arith.constant 0 : i32
    %c0_i32_1 = arith.constant 0 : i32
    return %c0_i32, %c0_i32_0 : i32, i32
  }
  func.func @transform_2(%arg0: i32) -> (i32, i32) {
    %c0_i32 = arith.constant 0 : i32
    %c0_i32_0 = arith.constant 0 : i32
    %c0_i32_1 = arith.constant 0 : i32
    return %c0_i32, %c0_i32_0 : i32, i32
  }
  func.func @transform_3(%arg0: i32) -> (i32, i32) {
    %c0_i32 = arith.constant 0 : i32
    %c0_i32_0 = arith.constant 0 : i32
    %c0_i32_1 = arith.constant 0 : i32
    return %c0_i32, %c0_i32_0 : i32, i32
  }
  func.func @transform_4(%arg0: i32) -> (i32, i32) {
    %c0_i32 = arith.constant 0 : i32
    %c0_i32_0 = arith.constant 0 : i32
    %c0_i32_1 = arith.constant 0 : i32
    return %c0_i32, %c0_i32_0 : i32, i32
  }
  func.func @transform_5(%arg0: i32) -> (i32, i32) {
    %c0_i32 = arith.constant 0 : i32
    %c0_i32_0 = arith.constant 0 : i32
    return %arg0, %c0_i32 : i32, i32
  }
}

</mosaic_0001>

<bundles_post_ra>
// kernel: window_classifier_forward.1
= control target key start
LH: loop header
LB: loop body
LE: loop exit
PB: predicated region body
PF: predicated region fallthrough
CT: control target
= control target key end

     0   :  { %v500_v2 = vmov 0   ;;  %v501_v3 = vmov 2   ;;  %v502_v6 = vmov 4   ;;  %s621_s0 = inlined_call_operand.vmem [shape: s32[8,5], index: 0, kind: input, shape index: {}]   ;;  %s622_s1 = inlined_call_operand.vmem [shape: bf16[256,128], index: 1, kind: input, shape index: {}]   ;;  %s623_s2 = inlined_call_operand.vmem [shape: f32[1,128], index: 2, kind: input, shape index: {}]   ;;  %s624_s3 = inlined_call_operand.vmem [shape: bf16[128,128], index: 3, kind: input, shape index: {}]   ;;  %s625_s4 = inlined_call_operand.vmem [shape: f32[1,128], index: 4, kind: input, shape index: {}]   ;;  %s626_s5 = inlined_call_operand.hbm [shape: f32[8,8], index: 5, kind: output, shape index: {}]  }
   0x1   :  { %v21_v0 = vld [vmem:[%s621_s0] sm:$0xff]  ;;  %v438_v1 = vld [vmem:[%s622_s1 + $0x38] sm:$0xff]  ;;  %462 = vset.pattern.permute.xlu0 %v500_v2  ;;  %464 = vset.pattern.permute.xlu1 %v501_v3  ;;  %v437_v8 = vld [vmem:[%s622_s1 + $0x30] sm:$0xff] }
   0x2   :  { %v38_v4 = vadd.s32 100, %v21_v0  ;;  %v446_v5 = vld [vmem:[%s622_s1 + $0x78] sm:$0xff]  ;;  %26 = vperm.xlu0 %462, %v21_v0   ;;  %466 = vset.pattern.permute.xlu2 %v502_v6  ;;  %v54_v7 = vadd.s32 200, %v21_v0  ;;  %v445_v9 = vld [vmem:[%s622_s1 + $0x70] sm:$0xff] }
   0x3   :  { %198 = vmatpush.bf16.msra.mxu0 %v438_v1  ;;  %211 = vmatpush.bf16.msra.mxu1 %v446_v5 }
   0x4   :  { %40 = vperm.xlu1 %464, %v38_v4   ;;  %56 = vperm.xlu2 %466, %v54_v7  }
   0x5   :  { %10 = vsyncpa [#allocation3], 0  ;;  %v30_v10 = vadd.s32 50, %v21_v0  ;;  %v46_v11 = vadd.s32 150, %v21_v0  ;;  %v436_v12 = vld [vmem:[%s622_s1 + $0x28] sm:$0xff]  ;;  %v503_v14 = vmov 1   ;;  %v22_v29 = vlaneseq }
   0x6   :  { %v444_v13 = vld [vmem:[%s622_s1 + $0x68] sm:$0xff]  ;;  %v504_v15 = vmov 3   ;;  %v435_v16 = vld [vmem:[%s622_s1 + $0x20] sm:$0xff]  ;;  %v434_v18 = vld [vmem:[%s622_s1 + $0x18] sm:$0xff]  ;;  %v505_v40 = vmov 0.0   ;;  %s326_s21 = sshll.u32 %s626_s5, 4  ;;  %s327_s21 = int_to_ptr.hbm [resolvable:$true] %s326_s21 }
   0x7   :  { %199 = vmatpush.bf16.msra.mxu0 %v437_v8  ;;  %212 = vmatpush.bf16.msra.mxu1 %v445_v9  ;;  %v443_v17 = vld [vmem:[%s622_s1 + $0x60] sm:$0xff]  ;;  %v442_v19 = vld [vmem:[%s622_s1 + $0x58] sm:$0xff]  ;;  %v433_v20 = vld [vmem:[%s622_s1 + $0x10] sm:$0xff]  ;;  %v23_v33 = vand.u32 127, %v22_v29 }
   0x8   :  { %v441_v21 = vld [vmem:[%s622_s1 + $0x50] sm:$0xff]  ;;  %v432_v22 = vld [vmem:[%s622_s1 + $0x8] sm:$0xff]  ;;  %v431_v24 = vld [vmem:[%s622_s1] sm:$0xff] }
   0x9   :  { %v440_v23 = vld [vmem:[%s622_s1 + $0x48] sm:$0xff]  ;;  %v439_v25 = vld [vmem:[%s622_s1 + $0x40] sm:$0xff]  ;;  %v454_v26 = vld [vmem:[%s624_s3 + $0x38] sm:$0xff]  ;;  %v24_v35 = vadd.s32 128, %v23_v33 }
   0xa   :  { %463 = vset.pattern.permute.xlu0 %v503_v14  ;;  %294 = vmatpush.bf16.msra.mxu2 %v454_v26  ;;  %v453_v27 = vld [vmem:[%s624_s3 + $0x30] sm:$0xff]  ;;  %v452_v28 = vld [vmem:[%s624_s3 + $0x28] sm:$0xff]  ;;  %v451_v31 = vld [vmem:[%s624_s3 + $0x20] sm:$0xff] }
   0xb   :  { %32 = vperm.xlu0 %463, %v30_v10   ;;  %200 = vmatpush.bf16.msra.mxu0 %v436_v12  ;;  %v450_v34 = vld [vmem:[%s624_s3 + $0x18] sm:$0xff]  ;;  %v449_v36 = vld [vmem:[%s624_s3 + $0x10] sm:$0xff]  ;;  %v448_v45 = vld [vmem:[%s624_s3 + $0x8] sm:$0xff] }
   0xc   :  { %465 = vset.pattern.permute.xlu1 %v504_v15  ;;  %213 = vmatpush.bf16.msra.mxu1 %v444_v13  ;;  %v447_v46 = vld [vmem:[%s624_s3] sm:$0xff] }
   0xd   :  { %48 = vperm.xlu1 %465, %v46_v11   ;;  %v468_v47 = vld [vmem:[%s623_s2] ss:$0 sm:$0xff]  ;;  %s506_s2 = smov [#allocation2]  }
   0xe   :  { %295 = vmatpush.bf16.msra.mxu2 %v453_v27  ;;  %v469_v56 = vld [vmem:[%s625_s4] ss:$0 sm:$0xff]  ;;  %s324_s3 = sshll.u32 %s506_s2, 4  ;;  %s325_s3 = int_to_ptr.vmem [resolvable:$true] %s324_s3 }
   0xf   :  { %201 = vmatpush.bf16.msra.mxu0 %v435_v16 }
  0x10   :  { %214 = vmatpush.bf16.msra.mxu1 %v443_v17 }
  0x12   :  { %296 = vmatpush.bf16.msra.mxu2 %v452_v28 }
  0x13   :  { %467 = vset.pattern.permute.xlu0 %v502_v6  ;;  %202 = vmatpush.bf16.msra.mxu0 %v434_v18 }
  0x14   :  { %215 = vmatpush.bf16.msra.mxu1 %v442_v19 }
  0x16   :  { %297 = vmatpush.bf16.msra.mxu2 %v451_v31 }
  0x17   :  { %203 = vmatpush.bf16.msra.mxu0 %v433_v20 }
  0x18   :  { %216 = vmatpush.bf16.msra.mxu1 %v441_v21 }
  0x1a   :  { %298 = vmatpush.bf16.msra.mxu2 %v450_v34 }
  0x1b   :  { %204 = vmatpush.bf16.msra.mxu0 %v432_v22 }
  0x1c   :  { %217 = vmatpush.bf16.msra.mxu1 %v440_v23 }
  0x1e   :  { %299 = vmatpush.bf16.msra.mxu2 %v449_v36 }
  0x1f   :  { %205 = vmatpush.bf16.msra.mxu0 %v431_v24 }
  0x20   :  { %218 = vmatpush.bf16.msra.mxu1 %v439_v25 }
  0x22   :  { %300 = vmatpush.bf16.msra.mxu2 %v448_v45 }
  0x26   :  { %301 = vmatpush.bf16.msra.mxu2 %v447_v46 }
  0x5e   :  { %v57_v39 = vpop.permute.xlu2 %56 }
  0x5f   :  { %vm58_vm12 = vcmp.eq.s32.totalorder %v23_v33, %v57_v39  ;;  %vm59_vm14 = vcmp.eq.s32.totalorder %v24_v35, %v57_v39 }
  0x74   :  { %v27_v30 = vpop.permute.xlu0 %26 }
  0x75   :  { %vm28_vm0 = vcmp.eq.s32.totalorder %v23_v33, %v27_v30  ;;  %vm29_vm3 = vcmp.eq.s32.totalorder %v24_v35, %v27_v30 }
  0x76   :  { %v41_v32 = vpop.permute.xlu1 %40 }
  0x77   :  { %vm42_vm5 = vcmp.eq.s32.totalorder %v23_v33, %v41_v32  ;;  %vm43_vm8 = vcmp.eq.s32.totalorder %v24_v35, %v41_v32 }
  0x7d   :  { %v33_v37 = vpop.permute.xlu0 %32 }
  0x7e   :  { %vm34_vm1 = vcmp.eq.s32.totalorder %v23_v33, %v33_v37  ;;  %vm35_vm2 = vcmp.eq.s32.totalorder %v24_v35, %v33_v37 }
  0x7f   :  { %v49_v38 = vpop.permute.xlu1 %48  ;;  %vm36_vm4 = vmor %vm28_vm0, %vm34_vm1 }
  0x80   :  { %vm37_vm6 = vmor %vm29_vm3, %vm35_vm2  ;;  %vm50_vm7 = vcmp.eq.s32.totalorder %v23_v33, %v49_v38  ;;  %vm51_vm10 = vcmp.eq.s32.totalorder %v24_v35, %v49_v38  ;;  %vm317_vm2 = vcmask 64512  }
  0x81   :  { %vm44_vm9 = vmor %vm36_vm4, %vm42_vm5 }
  0x82   :  { %vm45_vm11 = vmor %vm37_vm6, %vm43_vm8 }
  0x83   :  { %vm52_vm13 = vmor %vm44_vm9, %vm50_vm7 }
  0x84   :  { %vm53_vm15 = vmor %vm45_vm11, %vm51_vm10 }
  0x85   :  { %vm60_vm0 = vmor %vm52_vm13, %vm58_vm12 }
  0x86   :  { %v62_v41 = vsel %vm60_vm0, 1.0, %v505_v40  ;;  %vm61_vm1 = vmor %vm53_vm15, %vm59_vm14 }
  0x87   :  { %v64_v42 = vpack.c.bf16 %v62_v41, %v62_v41  ;;  %v63_v43 = vsel %vm61_vm1, 1.0, %v505_v40 }
  0x88   :  { %v65_v44 = vpack.c.bf16 %v63_v43, %v63_v43 }
  0x89   :  { %206 = vmatmul.bf16.vlgmr.msra.gmra.mxu0 %v64_v42 }
  0x8a   :  { %219 = vmatmul.bf16.vlgmr.msra.gmra.mxu1 %v65_v44 }
 0x106   :  { %v207_v48 = vpop.f32.mrf.mxu0 }
 0x107   :  { %v208_v49 = vadd.f32 %v468_v47, %v207_v48  ;;  %v220_v50 = vpop.f32.mrf.mxu1 }
 0x109   :  { %v221_v51 = vadd.f32 %v220_v50, %v208_v49 }
 0x10b   :  { %v224_v52 = vmax.f32 %v221_v51, 0.0 }
 0x10d   :  { %v225_v53 = vpack.c.bf16 %v224_v52, %v224_v52 }
 0x10e   :  { %v209_v54 = vpop.f32.mrf.mxu0 }
 0x10f   :  { %v222_v55 = vpop.f32.mrf.mxu1  ;;  %302 = vmatmul.bf16.vlgmr.msra.gmra.mxu2 %v225_v53 }
 0x192   :  { %v303_v57 = vpop.f32.mrf.mxu2 }
 0x193   :  { %v304_v58 = vadd.f32 %v469_v56, %v303_v57 }
 0x195   :  { %307 = vmax.xlane.f32.xlu2 %v304_v58 }
 0x19a   :  { %v305_v59 = vpop.f32.mrf.mxu2 }
 0x208   :  { %v308_v60 = vpop.xlane.xlu2 %307 }
 0x209   :  { %v309_v61 = vsub.f32 %v304_v58, %v308_v60 }
 0x20b   :  { %v310_v62 = vmul.f32 1.442695, %v309_v61 }
 0x20d   :  { %470 = vpow2.f32 %v310_v62 }
 0x213   :  { %v471_v63 = vpop.eup %470 }
 0x214   :  { %312 = vadd.xlane.f32.xlu1 %v471_v63 }
 0x287   :  { %v313_v0 = vpop.xlane.xlu1 %312 }
 0x288   :  { %472 = vlog2.f32 %v313_v0 }
 0x28e   :  { %v473_v1 = vpop.eup %472 }
 0x28f   :  { %v315_v2 = vmul.f32 0.6931472, %v473_v1 }
 0x291   :  { %v316_v3 = vsub.f32 %v309_v61, %v315_v2 }
 0x293   :  { %318 = vst.msk [vmem:[#allocation2] sm:$0xff] %vm317_vm2, %v316_v3 }
 0x294   :  { %329 = dma.vmem_to_hbm [thread:$0]  %s325_s3, 128, %s327_s21, [#allocation3]  }
 0x295   :  { %498 = dma.done.wait [#allocation3], 128  }
 0x296   :  { %499 = vsyncadd [#allocation3], 4294967168 }
 0x297   :  { %334 = vsyncpa [#allocation3], 1 }

</bundles_post_ra>
